<compile_context>
chip_gen: v5e
topology: v5e:2x2
jax: 0.10.0
libtpu: 0.0.40
codegen_flags: <defaults>
</compile_context>

<pallas_src>
import jax
import jax.numpy as jnp
from jax import lax
from jax.experimental import pallas as pl
from jax.experimental.pallas import tpu as pltpu

_TARGET_BLOCK_BYTES = 2 * 1024 * 1024  # ~2 MiB per input block


def _sublane_multiple(dtype):
    itemsize = jnp.dtype(dtype).itemsize
    return max(8, 32 // itemsize)  # 8 for f32, 16 for bf16, 32 for int8


# ----------------------------------------------------------------------------
# Kernels
# ----------------------------------------------------------------------------
def _abssum_kernel(x_ref, o_ref, acc_ref):
    """Grid-accumulated sum(|x|) -> (1,1). Cross-lane reduce only at the end."""
    @pl.when(pl.program_id(0) == 0)
    def _():
        acc_ref[...] = jnp.zeros_like(acc_ref)

    blk = jnp.abs(x_ref[...].astype(jnp.float32))
    acc_ref[...] += jnp.sum(blk, axis=0, keepdims=True)  # (1, lanes) accumulator

    @pl.when(pl.program_id(0) == pl.num_programs(0) - 1)
    def _():
        o_ref[...] = jnp.sum(acc_ref[...], axis=1, keepdims=True)


def _lsq_quant_kernel(scalars_ref, x_ref, o_ref):
    """Deterministic LSQ forward: round(clamp(x/alpha, Qn, Qp)) * alpha."""
    alpha = scalars_ref[0]
    qn = scalars_ref[1]
    qp = scalars_ref[2]
    inv_alpha = 1.0 / alpha
    data_q = jnp.clip(x_ref[...].astype(jnp.float32) * inv_alpha, qn, qp)
    o_ref[...] = (jnp.round(data_q) * alpha).astype(o_ref.dtype)


def _noise_quant_kernel(scalars_ref, seed_ref, x_ref, o_ref):
    """Training path: clamp(x/alpha + U(-0.5,0.5), Qn, Qp) * alpha.

    Noise is a counter-based hash of (seed, global element index), so it is
    portable (no TPU-only PRNG primitives) and independent of grid order.
    """
    alpha = scalars_ref[0]
    qn = scalars_ref[1]
    qp = scalars_ref[2]
    inv_alpha = 1.0 / alpha

    shape = x_ref.shape
    block_elems = shape[0] * shape[1]

    seed_u = seed_ref[0].astype(jnp.uint32)
    pid = pl.program_id(0).astype(jnp.uint32)
    row = lax.broadcasted_iota(jnp.int32, shape, 0).astype(jnp.uint32)
    col = lax.broadcasted_iota(jnp.int32, shape, 1).astype(jnp.uint32)
    gidx = pid * jnp.uint32(block_elems) + row * jnp.uint32(shape[1]) + col

    # lowbias32-style hash of (global index, seed)
    h = gidx + seed_u * jnp.uint32(0x9E3779B9)
    h = (h ^ (h >> 16)) * jnp.uint32(0x7FEB352D)
    h = (h ^ (h >> 15)) * jnp.uint32(0x846CA68B)
    h = h ^ (h >> 16)
    # top 24 bits -> uniform [0, 1) -> shift to [-0.5, 0.5)
    noise = (h >> 8).astype(jnp.float32) * jnp.float32(1.0 / (1 << 24)) - 0.5

    xq = x_ref[...].astype(jnp.float32) * inv_alpha + noise
    o_ref[...] = (jnp.clip(xq, qn, qp) * alpha).astype(o_ref.dtype)


# ----------------------------------------------------------------------------
# Slab layout helpers (lane-dense 2-D view of the flattened tensor)
# ----------------------------------------------------------------------------
def _to_slab(x):
    """Flatten x into a lane-dense (rows, lanes) slab.

    Returns (slab, n_valid, was_padded). Fast path is a pure reshape (no copy).
    """
    flat = x.reshape(-1)
    n = flat.shape[0]
    sub = _sublane_multiple(x.dtype)
    for lanes in (1024, 512, 256, 128):
        if n % lanes == 0 and (n // lanes) % sub == 0:
            return flat.reshape(n // lanes, lanes), n, False
    # Fallback: zero-pad to (rows, 128) with rows a multiple of the sublane tile.
    lanes = 128
    rows = pl.cdiv(n, lanes)
    rows = pl.cdiv(rows, sub) * sub
    padded = jnp.zeros((rows * lanes,), x.dtype).at[:n].set(flat)
    return padded.reshape(rows, lanes), n, True


def _pick_row_tile(rows, lanes, itemsize, sub):
    """Largest multiple of `sub` dividing `rows`, with block <= ~2 MiB."""
    target_rows = max(sub, _TARGET_BLOCK_BYTES // (lanes * itemsize))
    if rows <= target_rows:
        return rows
    best = sub
    d = sub
    limit = min(rows, target_rows)
    while d <= limit:
        if rows % d == 0:
            best = d
        d += sub
    return best


# ----------------------------------------------------------------------------
# pallas_call wrappers
# ----------------------------------------------------------------------------
def _abs_sum(x2d, row_tile):
    rows, lanes = x2d.shape
    out = pl.pallas_call(
        _abssum_kernel,
        out_shape=jax.ShapeDtypeStruct((1, 1), jnp.float32),
        grid_spec=pltpu.PrefetchScalarGridSpec(
            num_scalar_prefetch=0,
            grid=(rows // row_tile,),
            in_specs=[pl.BlockSpec((row_tile, lanes), lambda i: (i, 0))],
            out_specs=pl.BlockSpec((1, 1), lambda i: (0, 0)),
            scratch_shapes=[pltpu.VMEM((1, lanes), jnp.float32)],
        ),
        compiler_params=pltpu.CompilerParams(
            dimension_semantics=("arbitrary",)),
    )(x2d)
    return out[0, 0]


def _lsq_quant(x2d, row_tile, scalars):
    rows, lanes = x2d.shape
    return pl.pallas_call(
        _lsq_quant_kernel,
        out_shape=jax.ShapeDtypeStruct(x2d.shape, x2d.dtype),
        grid_spec=pltpu.PrefetchScalarGridSpec(
            num_scalar_prefetch=0,
            grid=(rows // row_tile,),
            in_specs=[
                pl.BlockSpec(memory_space=pltpu.MemorySpace.SMEM),
                pl.BlockSpec((row_tile, lanes), lambda i: (i, 0)),
            ],
            out_specs=pl.BlockSpec((row_tile, lanes), lambda i: (i, 0)),
        ),
        compiler_params=pltpu.CompilerParams(
            dimension_semantics=("parallel",)),
    )(scalars, x2d)


def _noise_quant(x2d, row_tile, scalars, seed):
    rows, lanes = x2d.shape
    return pl.pallas_call(
        _noise_quant_kernel,
        out_shape=jax.ShapeDtypeStruct(x2d.shape, x2d.dtype),
        grid_spec=pltpu.PrefetchScalarGridSpec(
            num_scalar_prefetch=0,
            grid=(rows // row_tile,),
            in_specs=[
                pl.BlockSpec(memory_space=pltpu.MemorySpace.SMEM),
                pl.BlockSpec(memory_space=pltpu.MemorySpace.SMEM),
                pl.BlockSpec((row_tile, lanes), lambda i: (i, 0)),
            ],
            out_specs=pl.BlockSpec((row_tile, lanes), lambda i: (i, 0)),
        ),
        compiler_params=pltpu.CompilerParams(
            dimension_semantics=("parallel",)),
    )(scalars, seed, x2d)


# ----------------------------------------------------------------------------
# Module-like wrapper (forward-pass semantics of Q_Sym)
# ----------------------------------------------------------------------------
class QSymPallas:
    """Q_Sym: Quantizer(sym=True, noise=True, offset=0, stochastic, discretize)."""

    def __init__(self, quant=False, training=True):
        self.quant = quant
        self.training = training
        self.offset = 0.0
        self.noise = True
        self.is_stochastic = True
        self.is_discretize = True
        # deterministic parameter init (matches Quantizer.__init__)
        self.bit = jnp.zeros((1,), jnp.float32)        # Parameter .zero_()
        self.alpha = jnp.full((1,), 1.0, jnp.float32)  # Parameter .fill_(1)
        self.init_state = 0                            # buffer init_state
        # NOTE: Python-side state mutation (alpha / init_state) means this
        # wrapper must not be traced by jax.jit across the init boundary.

    def __call__(self, x, rng=None):
        if not self.quant:
            return x
        if rng is None:
            rng = jax.random.PRNGKey(42)

        bit = 2.0 + jax.nn.sigmoid(self.bit) * 12.0
        if self.training and self.noise and self.is_stochastic:
            rng, sub = jax.random.split(rng)
            bit = bit + jax.random.uniform(sub, bit.shape) - 0.5
        if (not self.training) or self.is_discretize:
            bit = jnp.round(bit)  # forward value of the STE
        bit_r = jnp.round(bit)[0]
        qp = 2.0 ** (bit_r - 1.0) - 1.0   # sym=True
        qn = -(2.0 ** (bit_r - 1.0))

        x2d, n, was_padded = _to_slab(x)
        rows, lanes = x2d.shape
        sub_rows = _sublane_multiple(x.dtype)
        row_tile = _pick_row_tile(rows, lanes, jnp.dtype(x.dtype).itemsize,
                                  sub_rows)

        if self.training and self.init_state == 0:
            abs_mean = _abs_sum(x2d, row_tile) / n  # padding is zeros -> exact
            self.alpha = (abs_mean * 2.0 / jnp.sqrt(qp)).reshape(1).astype(
                jnp.float32)
            self.init_state = 1

        alpha = self.alpha[0]
        scalars = jnp.stack([alpha, qn, qp]).astype(jnp.float32)

        if self.training and self.noise:
            rng, sub = jax.random.split(rng)
            seed = jax.random.randint(sub, (1,), 0,
                                      jnp.iinfo(jnp.int32).max, jnp.int32)
            y2d = _noise_quant(x2d, row_tile, scalars, seed)
        else:
            y2d = _lsq_quant(x2d, row_tile, scalars)

        if was_padded:
            return y2d.reshape(-1)[:n].reshape(x.shape)
        return y2d.reshape(x.shape)


# ----------------------------------------------------------------------------
if __name__ == "__main__":
    key = jax.random.PRNGKey(0)
    x = jax.random.normal(key, (2, 4, 16, 16), dtype=jnp.float32)  # NCHW

    # 1) default Q_Sym: quant=False -> identity
    m_id = QSymPallas(quant=False, training=True)
    y_id = jax.block_until_ready(m_id(x))
    assert jnp.array_equal(y_id, x)

    # 2) quant=True, eval mode -> deterministic LSQ path (alpha stays 1, bit=8)
    m_eval = QSymPallas(quant=True, training=False)
    y_eval = jax.block_until_ready(m_eval(x))
    qp8, qn8 = 127.0, -128.0
    ref_eval = jnp.round(jnp.clip(x / 1.0, qn8, qp8)) * 1.0
    assert jnp.allclose(y_eval, ref_eval, atol=1e-5), "eval LSQ path mismatch"

    # 3) quant=True, training mode -> alpha init (reduction kernel) + noise kernel
    m_tr = QSymPallas(quant=True, training=True)
    y_tr = jax.block_until_ready(m_tr(x, rng=jax.random.PRNGKey(1)))
    alpha_tr = m_tr.alpha[0]
    ref_alpha = jnp.mean(jnp.abs(x)) * 2.0 / jnp.sqrt(127.0)
    assert jnp.allclose(alpha_tr, ref_alpha, rtol=1e-5), "alpha init mismatch"
    assert y_tr.shape == x.shape and jnp.all(jnp.isfinite(y_tr))
    # quantized values must live in [Qn, Qp] * alpha
    assert jnp.all(y_tr / alpha_tr >= qn8 - 1e-3)
    assert jnp.all(y_tr / alpha_tr <= qp8 + 1e-3)

    print("KERNEL_OK")
</pallas_src>

<mosaic_0001>
module attributes {stable_mosaic.version = 11 : i64} {
  func.func @_lsq_quant_kernel(%arg0: i32, %arg1: memref<3xf32, #tpu.memory_space<smem>>, %arg2: memref<8x256xf32, #tpu.memory_space<vmem>>, %arg3: memref<8x256xf32, #tpu.memory_space<vmem>>) attributes {dimension_semantics = [#tpu.dimension_semantics<parallel>], iteration_bounds = array<i64: 1>, scalar_prefetch = 0 : i64, scratch_operands = 0 : i64, tpu.core_type = #tpu.core_type<tc>, window_params = [{transform_indices = @transform_0, window_bounds = array<i64: 3>}, {transform_indices = @transform_1, window_bounds = array<i64: 8, 256>}, {transform_indices = @transform_2, window_bounds = array<i64: 8, 256>}]} {
    %c0 = arith.constant 0 : index
    %0 = memref.load %arg1[%c0] : memref<3xf32, #tpu.memory_space<smem>>
    %c1 = arith.constant 1 : index
    %1 = memref.load %arg1[%c1] : memref<3xf32, #tpu.memory_space<smem>>
    %c2 = arith.constant 2 : index
    %2 = memref.load %arg1[%c2] : memref<3xf32, #tpu.memory_space<smem>>
    %cst = arith.constant 1.000000e+00 : f32
    %3 = arith.divf %cst, %0 : f32
    %c0_0 = arith.constant 0 : index
    %c0_1 = arith.constant 0 : index
    %4 = vector.load %arg2[%c0_0, %c0_1] : memref<8x256xf32, #tpu.memory_space<vmem>>, vector<8x256xf32>
    %5 = vector.broadcast %3 : f32 to vector<8x256xf32>
    %6 = arith.mulf %4, %5 : vector<8x256xf32>
    %7 = vector.broadcast %1 : f32 to vector<8x256xf32>
    %8 = arith.maximumf %7, %6 : vector<8x256xf32>
    %9 = vector.broadcast %2 : f32 to vector<8x256xf32>
    %10 = arith.minimumf %9, %8 : vector<8x256xf32>
    %11 = math.roundeven %10 : vector<8x256xf32>
    %12 = vector.broadcast %0 : f32 to vector<8x256xf32>
    %13 = arith.mulf %11, %12 : vector<8x256xf32>
    %c0_2 = arith.constant 0 : index
    %c0_3 = arith.constant 0 : index
    %14 = vector.load %arg3[%c0_2, %c0_3] : memref<8x256xf32, #tpu.memory_space<vmem>>, vector<8x256xf32>
    tpu.vector_store %arg3[%c0_2, %c0_3], %13 {strides = array<i32>} : memref<8x256xf32, #tpu.memory_space<vmem>>, vector<8x256xf32>,
    return
  }
  func.func @transform_0(%arg0: i32) -> i32 {
    %c0_i32 = arith.constant 0 : i32
    %c0_i32_0 = arith.constant 0 : i32
    return %c0_i32 : i32
  }
  func.func @transform_1(%arg0: i32) -> (i32, i32) {
    %c0_i32 = arith.constant 0 : i32
    %c0_i32_0 = arith.constant 0 : i32
    return %arg0, %c0_i32 : i32, i32
  }
  func.func @transform_2(%arg0: i32) -> (i32, i32) {
    %c0_i32 = arith.constant 0 : i32
    %c0_i32_0 = arith.constant 0 : i32
    return %arg0, %c0_i32 : i32, i32
  }
}

</mosaic_0001>

<bundles_post_ra>
// kernel: tpu_custom_call.1
= control target key start
LH: loop header
LB: loop body
LE: loop exit
PB: predicated region body
PF: predicated region fallthrough
CT: control target
= control target key end

     0   :  { %7 = vsyncpa [#allocation5], 0  ;;  %s212_s0 = inlined_call_operand.hbm [shape: f32[3], index: 0, kind: input, shape index: {}]   ;;  %s213_s1 = inlined_call_operand.hbm [shape: f32[8,256], index: 1, kind: input, shape index: {}]   ;;  %s214_s2 = inlined_call_operand.hbm [shape: f32[8,256], index: 2, kind: output, shape index: {}]  }
   0x1   :  { %8 = vsyncpa [#allocation3], 0 }
   0x2   :  { %9 = vsyncpa [#allocation4], 0  ;;  %s15_s11 = sshll.u32 %s212_s0, 4  ;;  %s24_s14 = sshll.u32 %s213_s1, 4  ;;  %s16_s11 = int_to_ptr.hbm [resolvable:$true] %s15_s11  ;;  %s25_s14 = int_to_ptr.hbm [resolvable:$true] %s24_s14 }
   0x3   :  { %s185_s15 = smov [#allocation2]   ;;  %s186_s16 = smov [#allocation6]  }
   0x4   :  { %18 = dma.hbm_to_smem %s16_s11, 16, %s185_s15, [#allocation5]  }
   0x5   :  { %s26_s17 = sshll.u32 %s186_s16, 4  ;;  %s27_s17 = int_to_ptr.vmem [resolvable:$true] %s26_s17 }
   0x6   :  { %29 = dma.hbm_to_vmem [thread:$0]  %s25_s14, 256, %s27_s17, [#allocation3]  }
   0x7   :  { %179 = dma.done.wait [#allocation5], 16  }
   0x8   :  { %180 = vsyncadd [#allocation5], 4294967280 }
   0x9   :  { %181 = dma.done.wait [#allocation3], 256  }
   0xa   :  { %182 = vsyncadd [#allocation3], 4294967040 }
   0xb   :  { %38 = sfence }
   0xc   :  { %s39_s18 = sld [smem:[#allocation2]]  ;;  %v58_v11 = vld [vmem:[#allocation6] sm:$0xff]  ;;  %v59_v12 = vld [vmem:[#allocation6 + $0x8] sm:$0xff]  ;;  %s187_s20 = smov [#allocation7]  }
   0xd   :  { %s94_s0 = sld [smem:[#allocation2 + $0x1]]  ;;  %s81_s21 = sshll.u32 %s187_s20, 4  ;;  %s82_s21 = int_to_ptr.vmem [resolvable:$true] %s81_s21 }
   0xe   :  { %s95_s1 = sld [smem:[#allocation2 + $0x2]]  ;;  %s83_s24 = sshll.u32 %s214_s2, 4  ;;  %s84_s24 = int_to_ptr.hbm [resolvable:$true] %s83_s24 }
  0x12   :  { %v42_v0 = vstv %s39_s18 }
  0x13   :  { %117 = vrcp.f32 %v42_v0  ;;  %v54_v3 = vand.u32 2147483648, %v42_v0  ;;  %vm48_vm0 = vweird.f32 %v42_v0  ;;  %v52_v5 = vand.u32 2147483647, %v42_v0 }
  0x14   :  { %v63_v14 = vstv %s94_s0  ;;  %v66_v17 = vstv %s95_s1 }
  0x15   :  { %v55_v7 = vor.u32 1.1754944e-38, %v54_v3  ;;  %vm53_vm3 = vcmp.eq.f32.partialorder %v52_v5, 8.507059e+37 }
  0x19   :  { %v118_v1 = vpop.eup %117 }
  0x1a   :  { %v44_v2 = vmul.f32 %v118_v1, %v42_v0  ;;  %vm49_vm1 = vweird.f32 %v118_v1 }
  0x1b   :  { %vm50_vm2 = vmor %vm48_vm0, %vm49_vm1 }
  0x1c   :  { %v45_v4 = vsub.f32 1.0, %v44_v2 }
  0x1e   :  { %v46_v6 = vmul.f32 %v118_v1, %v45_v4 }
  0x20   :  { %v47_v8 = vadd.f32 %v118_v1, %v46_v6 }
  0x22   :  { %v51_v9 = vsel %vm50_vm2, %v118_v1, %v47_v8 }
  0x23   :  { %v56_v10 = vsel %vm53_vm3, %v55_v7, %v51_v9 }
  0x24   :  { %96 = vpush %v56_v10 }
  0x55   :  { %s97_s19 = spop %96 }
  0x56   :  { %v60_v13 = vstv %s97_s19 }
  0x57   :  { %v61_v15 = vmul.f32 %v60_v13, %v58_v11  ;;  %v62_v16 = vmul.f32 %v60_v13, %v59_v12 }
  0x59   :  { %v64_v18 = vmax.f32 %v63_v14, %v61_v15  ;;  %v65_v19 = vmax.f32 %v63_v14, %v62_v16 }
  0x5b   :  { %v67_v20 = vmin.f32 %v66_v17, %v64_v18  ;;  %v68_v21 = vmin.f32 %v66_v17, %v65_v19 }
  0x5d   :  { %v100_v22 = vcvt.f32.s32 %v67_v20  ;;  %v108_v23 = vcvt.f32.s32 %v68_v21  ;;  %v98_v25 = vand.u32 2147483647, %v67_v20  ;;  %v103_v28 = vand.u32 2147483648, %v67_v20 }
  0x5e   :  { %v106_v29 = vand.u32 2147483647, %v68_v21  ;;  %v111_v31 = vand.u32 2147483648, %v68_v21 }
  0x5f   :  { %v101_v24 = vcvt.s32.f32 %v100_v22  ;;  %v109_v26 = vcvt.s32.f32 %v108_v23  ;;  %vm99_vm4 = vcmp.lt.f32.partialorder %v98_v25, 8388608.0 }
  0x60   :  { %vm107_vm5 = vcmp.lt.f32.partialorder %v106_v29, 8388608.0 }
  0x61   :  { %v102_v27 = vand.u32 2147483647, %v101_v24  ;;  %v110_v30 = vand.u32 2147483647, %v109_v26 }
  0x63   :  { %v104_v32 = vor.u32 %v103_v28, %v102_v27  ;;  %v112_v33 = vor.u32 %v111_v31, %v110_v30 }
  0x65   :  { %v105_v34 = vsel %vm99_vm4, %v104_v32, %v67_v20  ;;  %v113_v35 = vsel %vm107_vm5, %v112_v33, %v68_v21 }
  0x66   :  { %v72_v36 = vmul.f32 %v105_v34, %v42_v0  ;;  %v73_v37 = vmul.f32 %v113_v35, %v42_v0 }
  0x68   :  { %74 = vst [vmem:[#allocation7] sm:$0xff] %v72_v36 }
  0x69   :  { %75 = vst [vmem:[#allocation7 + $0x8] sm:$0xff] %v73_v37 }
  0x6a   :  { %86 = dma.vmem_to_hbm [thread:$0]  %s82_s21, 256, %s84_s24, [#allocation4]  }
  0x6b   :  { %183 = dma.done.wait [#allocation4], 256  }
  0x6c   :  { %184 = vsyncadd [#allocation4], 4294967040 }
  0x6d   :  { %91 = vsyncpa [#allocation3], 1 }
  0x6e   :  { %92 = vsyncpa [#allocation4], 1 }
  0x6f   :  { %93 = vsyncpa [#allocation5], 1 }

</bundles_post_ra>
